<compile_context>
chip_gen: v7x
topology: tpu7x:2x2x1
jax: 0.10.0
libtpu: 0.0.40
codegen_flags: <defaults>
</compile_context>

<pallas_src>
import functools

import jax
import jax.numpy as jnp
from jax import lax
from jax.experimental import pallas as pl
from jax.experimental.pallas import tpu as pltpu

_LANE = 128
_SUB = 8
_TILE_B = 4096  # rows per grid step at large batch


def _round_up(n, m):
    return ((n + m - 1) // m) * m


def _pad2(a, rows, cols):
    return jnp.pad(a, ((0, rows - a.shape[0]), (0, cols - a.shape[1])))


def _mlp_kernel(x_ref, w1_ref, b1_ref, w2_ref, b2_ref, w3t_ref, b3t_ref, o_ref,
                *, out_rows):
    # fc1 + ReLU: MXU in bf16, accumulate f32, elementwise in f32.
    x = x_ref[...]                                                   # (tile_b, in) bf16
    h1 = jnp.dot(x, w1_ref[...], preferred_element_type=jnp.float32) + b1_ref[...]
    h1 = jnp.maximum(h1, 0.0)
    # fc2 + ReLU
    h2 = jnp.dot(h1.astype(jnp.bfloat16), w2_ref[...],
                 preferred_element_type=jnp.float32) + b2_ref[...]
    h2 = jnp.maximum(h2, 0.0)
    # fc3 transposed: (out_rows_p, h2p) x (tile_b, h2p)^T -> (out_rows_p, tile_b).
    # Batch sits on the lane axis, so the final store is lane-dense and narrow.
    zt = lax.dot_general(w3t_ref[...], h2.astype(jnp.bfloat16),
                         dimension_numbers=(((1,), (1,)), ((), ())),
                         preferred_element_type=jnp.float32)
    # Keep only the real output rows before bias/sigmoid/store (4 B/row, not 512 B).
    z = zt[:out_rows, :] + b3t_ref[0:out_rows, :]
    o_ref[...] = jax.nn.sigmoid(z)


def titanic_nn_forward(x, params):
    """Fused TitanicNN forward. params = (w1, b1, w2, b2, w3, b3) with
    w_i shaped (in, out) and b_i shaped (1, out), all float32."""
    w1, b1, w2, b2, w3, b3 = params
    batch, in_size = x.shape
    h1, h2, out_size = w1.shape[1], w2.shape[1], w3.shape[1]

    # Lane-dense padded hidden widths (zero padding is exact: padded ReLU lanes
    # stay 0 and never contribute; padded w3 rows are never stored).
    h1p = _round_up(h1, _LANE)
    h2p = _round_up(h2, _LANE)
    out_rows_p = _round_up(out_size, _SUB)

    # Batch tile: large tiles to amortize the ~0.35 us/step pipeline overhead,
    # but keep >=2 grid steps whenever batch allows so the 'parallel' axis can
    # shard across both v7x TensorCores.
    padded_pre = _round_up(batch, _LANE)
    if padded_pre >= 2 * _LANE:
        tile_b = min(_TILE_B, _round_up(padded_pre // 2, _LANE))
    else:
        tile_b = padded_pre
    padded_batch = _round_up(batch, tile_b)
    grid = (padded_batch // tile_b,)

    # bf16 MXU operands (halves the only batch-scaling HBM stream), f32 biases.
    # K = in_size stays unpadded: the (tile_b, in_size) block is legal because
    # in_size is the full array dim, and padding K would 16x the x read stream.
    xp = jnp.pad(x, ((0, padded_batch - batch), (0, 0))).astype(jnp.bfloat16)
    w1p = _pad2(w1, in_size, h1p).astype(jnp.bfloat16)
    b1p = _pad2(b1, 1, h1p).astype(jnp.float32)
    w2p = _pad2(w2, h1p, h2p).astype(jnp.bfloat16)
    b2p = _pad2(b2, 1, h2p).astype(jnp.float32)
    # fc3 stored transposed: (out, hidden) so the last matmul puts batch on lanes.
    w3tp = _pad2(w3.T, out_rows_p, h2p).astype(jnp.bfloat16)
    b3tp = _pad2(b3.T, out_rows_p, 1).astype(jnp.float32)

    # Weights/biases: full-array blocks, constant index map -> VMEM resident.
    resident = lambda a: pl.BlockSpec(a.shape, lambda i: (0, 0))

    # Honest (unpadded-width) scheduling hint.
    flops = 2 * batch * (in_size * h1 + h1 * h2 + h2 * out_size)
    bytes_accessed = (batch * in_size * 2
                      + (w1p.size + w2p.size + w3tp.size) * 2
                      + (b1p.size + b2p.size + b3tp.size) * 4
                      + batch * out_size * 4)

    kernel = functools.partial(_mlp_kernel, out_rows=out_size)

    out_t = pl.pallas_call(
        kernel,
        out_shape=jax.ShapeDtypeStruct((out_size, padded_batch), jnp.float32),
        grid=grid,
        in_specs=[
            pl.BlockSpec((tile_b, in_size), lambda i: (i, 0)),  # x streams over batch
            resident(w1p), resident(b1p),
            resident(w2p), resident(b2p),
            resident(w3tp), resident(b3tp),
        ],
        out_specs=pl.BlockSpec((out_size, tile_b), lambda i: (0, i)),
        compiler_params=pltpu.CompilerParams(
            dimension_semantics=("parallel",),
            vmem_limit_bytes=32 * 1024 * 1024),
        cost_estimate=pl.CostEstimate(
            flops=flops,
            transcendentals=batch * out_size,
            bytes_accessed=bytes_accessed),
    )(xp, w1p, b1p, w2p, b2p, w3tp, b3tp)

    # (out_size, padded_batch) -> (batch, out_size)
    return out_t[:, :batch].T


def init_params(key, input_size, hidden_sizes, output_size):
    """Deterministic init mimicking nn.Linear default U(-1/sqrt(fan_in), 1/sqrt(fan_in)).
    Returns weights already transposed to (in, out)."""
    dims = [input_size, hidden_sizes[0], hidden_sizes[1], output_size]
    params = []
    for i in range(3):
        fan_in, fan_out = dims[i], dims[i + 1]
        key, kw, kb = jax.random.split(key, 3)
        bound = 1.0 / jnp.sqrt(fan_in)
        w = jax.random.uniform(kw, (fan_in, fan_out), jnp.float32, -bound, bound)
        b = jax.random.uniform(kb, (1, fan_out), jnp.float32, -bound, bound)
        params += [w, b]
    return tuple(params)


def _reference_forward_f32(x, params):
    """Pure f32 reference (matches the PyTorch module's math)."""
    w1, b1, w2, b2, w3, b3 = params
    h1 = jax.nn.relu(x @ w1 + b1)
    h2 = jax.nn.relu(h1 @ w2 + b2)
    return jax.nn.sigmoid(h2 @ w3 + b3)


def _reference_forward_bf16(x, params):
    """Reference with the same bf16 quantization of MXU inputs, math in f32."""
    w1, b1, w2, b2, w3, b3 = params
    q = lambda a: a.astype(jnp.bfloat16).astype(jnp.float32)
    h1 = jax.nn.relu(q(x) @ q(w1) + b1)
    h2 = jax.nn.relu(q(h1) @ q(w2) + b2)
    return jax.nn.sigmoid(q(h2) @ q(w3) + b3)


if __name__ == "__main__":
    # Small shapes consistent with the module: Titanic-style tabular input.
    batch = 8
    input_size = 8
    hidden_sizes = [32, 16]
    output_size = 1

    key = jax.random.PRNGKey(0)
    key, kx = jax.random.split(key)
    x = jax.random.normal(kx, (batch, input_size), dtype=jnp.float32)
    params = init_params(key, input_size, hidden_sizes, output_size)

    out = titanic_nn_forward(x, params)
    out = jax.block_until_ready(out)
    assert out.shape == (batch, output_size)

    # Tight check vs. the bf16-quantized reference (same MXU-input precision).
    ref_bf16 = _reference_forward_bf16(x, params)
    assert jnp.allclose(out, ref_bf16, atol=1e-3, rtol=1e-3)
    # Looser check vs. the pure-f32 PyTorch-equivalent reference (documents the
    # deliberate bf16-MXU-input precision trade-off).
    ref_f32 = _reference_forward_f32(x, params)
    assert jnp.allclose(out, ref_f32, atol=2e-2, rtol=2e-2)

    print("KERNEL_OK")
</pallas_src>

<mosaic_0001>
module attributes {stable_mosaic.version = 11 : i64} {
  func.func @_mlp_kernel(%arg0: i32, %arg1: memref<128x8xbf16, #tpu.memory_space<vmem>>, %arg2: memref<8x128xbf16, #tpu.memory_space<vmem>>, %arg3: memref<1x128xf32, #tpu.memory_space<vmem>>, %arg4: memref<128x128xbf16, #tpu.memory_space<vmem>>, %arg5: memref<1x128xf32, #tpu.memory_space<vmem>>, %arg6: memref<8x128xbf16, #tpu.memory_space<vmem>>, %arg7: memref<8x1xf32, #tpu.memory_space<vmem>>, %arg8: memref<1x128xf32, #tpu.memory_space<vmem>>) attributes {dimension_semantics = [#tpu.dimension_semantics<parallel>], iteration_bounds = array<i64: 1>, scalar_prefetch = 0 : i64, scratch_operands = 0 : i64, tpu.core_type = #tpu.core_type<tc>, window_params = [{transform_indices = @transform_0, window_bounds = array<i64: 128, 8>}, {pipeline_mode = #tpu.pipeline_mode<synchronous>, transform_indices = @transform_1, window_bounds = array<i64: 8, 128>}, {pipeline_mode = #tpu.pipeline_mode<synchronous>, transform_indices = @transform_2, window_bounds = array<i64: 1, 128>}, {pipeline_mode = #tpu.pipeline_mode<synchronous>, transform_indices = @transform_3, window_bounds = array<i64: 128, 128>}, {pipeline_mode = #tpu.pipeline_mode<synchronous>, transform_indices = @transform_4, window_bounds = array<i64: 1, 128>}, {pipeline_mode = #tpu.pipeline_mode<synchronous>, transform_indices = @transform_5, window_bounds = array<i64: 8, 128>}, {pipeline_mode = #tpu.pipeline_mode<synchronous>, transform_indices = @transform_6, window_bounds = array<i64: 8, 1>}, {transform_indices = @transform_7, window_bounds = array<i64: 1, 128>}]} {
    %c0 = arith.constant 0 : index
    %c0_0 = arith.constant 0 : index
    %0 = vector.load %arg1[%c0, %c0_0] : memref<128x8xbf16, #tpu.memory_space<vmem>>, vector<128x8xbf16>
    %c0_1 = arith.constant 0 : index
    %c0_2 = arith.constant 0 : index
    %1 = vector.load %arg2[%c0_1, %c0_2] : memref<8x128xbf16, #tpu.memory_space<vmem>>, vector<8x128xbf16>
    %cst = arith.constant dense<0.000000e+00> : vector<128x128xf32>
    %2 = tpu.matmul %0, %1, %cst {dimension_numbers = #tpu.dot_dimension_numbers<[1], [0], [0], [1], [0, 0, 1, 1], [], []>} : vector<128x8xbf16>, vector<8x128xbf16>, vector<128x128xf32> -> vector<128x128xf32>
    %c0_3 = arith.constant 0 : index
    %c0_4 = arith.constant 0 : index
    %3 = vector.load %arg3[%c0_3, %c0_4] : memref<1x128xf32, #tpu.memory_space<vmem>>, vector<1x128xf32>
    %4 = vector.broadcast %3 : vector<1x128xf32> to vector<128x128xf32>
    %5 = arith.addf %2, %4 : vector<128x128xf32>
    %cst_5 = arith.constant 0.000000e+00 : f32
    %6 = vector.broadcast %cst_5 : f32 to vector<128x128xf32>
    %7 = arith.maximumf %5, %6 : vector<128x128xf32>
    %8 = arith.truncf %7 : vector<128x128xf32> to vector<128x128xbf16>
    %c0_6 = arith.constant 0 : index
    %c0_7 = arith.constant 0 : index
    %9 = vector.load %arg4[%c0_6, %c0_7] : memref<128x128xbf16, #tpu.memory_space<vmem>>, vector<128x128xbf16>
    %cst_8 = arith.constant dense<0.000000e+00> : vector<128x128xf32>
    %10 = tpu.matmul %8, %9, %cst_8 {dimension_numbers = #tpu.dot_dimension_numbers<[1], [0], [0], [1], [0, 0, 1, 1], [], []>} : vector<128x128xbf16>, vector<128x128xbf16>, vector<128x128xf32> -> vector<128x128xf32>
    %c0_9 = arith.constant 0 : index
    %c0_10 = arith.constant 0 : index
    %11 = vector.load %arg5[%c0_9, %c0_10] : memref<1x128xf32, #tpu.memory_space<vmem>>, vector<1x128xf32>
    %12 = vector.broadcast %11 : vector<1x128xf32> to vector<128x128xf32>
    %13 = arith.addf %10, %12 : vector<128x128xf32>
    %cst_11 = arith.constant 0.000000e+00 : f32
    %14 = vector.broadcast %cst_11 : f32 to vector<128x128xf32>
    %15 = arith.maximumf %13, %14 : vector<128x128xf32>
    %c0_12 = arith.constant 0 : index
    %c0_13 = arith.constant 0 : index
    %16 = vector.load %arg6[%c0_12, %c0_13] : memref<8x128xbf16, #tpu.memory_space<vmem>>, vector<8x128xbf16>
    %17 = arith.truncf %15 : vector<128x128xf32> to vector<128x128xbf16>
    %cst_14 = arith.constant dense<0.000000e+00> : vector<8x128xf32>
    %18 = tpu.matmul %16, %17, %cst_14 {dimension_numbers = #tpu.dot_dimension_numbers<[1], [1], [0], [0], [0, 0, 1, 0], [], []>} : vector<8x128xbf16>, vector<128x128xbf16>, vector<8x128xf32> -> vector<8x128xf32>
    %19 = vector.extract_strided_slice %18 {offsets = [0, 0], sizes = [1, 128], strides = [1, 1]} : vector<8x128xf32> to vector<1x128xf32>
    %c0_15 = arith.constant 0 : index
    %c0_16 = arith.constant 0 : index
    %20 = vector.load %arg7[%c0_15, %c0_16] : memref<8x1xf32, #tpu.memory_space<vmem>>, vector<1x1xf32>
    %21 = vector.broadcast %20 : vector<1x1xf32> to vector<1x128xf32>
    %22 = arith.addf %19, %21 : vector<1x128xf32>
    %23 = arith.negf %22 : vector<1x128xf32>
    %24 = math.exp %23 : vector<1x128xf32>
    %cst_17 = arith.constant 1.000000e+00 : f32
    %25 = vector.broadcast %cst_17 : f32 to vector<1x128xf32>
    %26 = arith.addf %25, %24 : vector<1x128xf32>
    %27 = arith.divf %25, %26 : vector<1x128xf32>
    %c0_18 = arith.constant 0 : index
    %c0_19 = arith.constant 0 : index
    %28 = vector.load %arg8[%c0_18, %c0_19] : memref<1x128xf32, #tpu.memory_space<vmem>>, vector<1x128xf32>
    tpu.vector_store %arg8[%c0_18, %c0_19], %27 {strides = array<i32>} : memref<1x128xf32, #tpu.memory_space<vmem>>, vector<1x128xf32>,
    return
  }
  func.func @transform_0(%arg0: i32) -> (i32, i32) {
    %c0_i32 = arith.constant 0 : i32
    %c0_i32_0 = arith.constant 0 : i32
    return %arg0, %c0_i32 : i32, i32
  }
  func.func @transform_1(%arg0: i32) -> (i32, i32) {
    %c0_i32 = arith.constant 0 : i32
    %c0_i32_0 = arith.constant 0 : i32
    %c0_i32_1 = arith.constant 0 : i32
    return %c0_i32, %c0_i32_0 : i32, i32
  }
  func.func @transform_2(%arg0: i32) -> (i32, i32) {
    %c0_i32 = arith.constant 0 : i32
    %c0_i32_0 = arith.constant 0 : i32
    %c0_i32_1 = arith.constant 0 : i32
    return %c0_i32, %c0_i32_0 : i32, i32
  }
  func.func @transform_3(%arg0: i32) -> (i32, i32) {
    %c0_i32 = arith.constant 0 : i32
    %c0_i32_0 = arith.constant 0 : i32
    %c0_i32_1 = arith.constant 0 : i32
    return %c0_i32, %c0_i32_0 : i32, i32
  }
  func.func @transform_4(%arg0: i32) -> (i32, i32) {
    %c0_i32 = arith.constant 0 : i32
    %c0_i32_0 = arith.constant 0 : i32
    %c0_i32_1 = arith.constant 0 : i32
    return %c0_i32, %c0_i32_0 : i32, i32
  }
  func.func @transform_5(%arg0: i32) -> (i32, i32) {
    %c0_i32 = arith.constant 0 : i32
    %c0_i32_0 = arith.constant 0 : i32
    %c0_i32_1 = arith.constant 0 : i32
    return %c0_i32, %c0_i32_0 : i32, i32
  }
  func.func @transform_6(%arg0: i32) -> (i32, i32) {
    %c0_i32 = arith.constant 0 : i32
    %c0_i32_0 = arith.constant 0 : i32
    %c0_i32_1 = arith.constant 0 : i32
    return %c0_i32, %c0_i32_0 : i32, i32
  }
  func.func @transform_7(%arg0: i32) -> (i32, i32) {
    %c0_i32 = arith.constant 0 : i32
    %c0_i32_0 = arith.constant 0 : i32
    return %c0_i32, %arg0 : i32, i32
  }
}

</mosaic_0001>

<bundles_post_ra>
// kernel: tpu_custom_call.1
= control target key start
LH: loop header
LB: loop body
LE: loop exit
PB: predicated region body
PF: predicated region fallthrough
CT: control target
= control target key end

     0   :  { %vm117_vm0 = vcmask 1043456   ;;  %vm92_vm1 = vcmask 64512   ;;  %s820_s0 = inlined_call_operand.vmem [shape: bf16[128,8], index: 0, kind: input, shape index: {}]   ;;  %s821_s1 = inlined_call_operand.vmem [shape: bf16[8,128], index: 1, kind: input, shape index: {}]   ;;  %s822_s2 = inlined_call_operand.vmem [shape: f32[1,128], index: 2, kind: input, shape index: {}]   ;;  %s823_s3 = inlined_call_operand.vmem [shape: bf16[128,128], index: 3, kind: input, shape index: {}]   ;;  %s824_s4 = inlined_call_operand.vmem [shape: f32[1,128], index: 4, kind: input, shape index: {}]   ;;  %s825_s5 = inlined_call_operand.vmem [shape: bf16[8,128], index: 5, kind: input, shape index: {}]   ;;  %s826_s6 = inlined_call_operand.vmem [shape: f32[8,1], index: 6, kind: input, shape index: {}]   ;;  %s827_s7 = inlined_call_operand.hbm [shape: f32[1,128], index: 7, kind: output, shape index: {}]  }
   0x1   :  { %v44_v0 = vld [vmem:[%s821_s1] sm:$0xf]  ;;  %v641_v3 = vld [vmem:[%s820_s0 + $0x8] sm:$0xff]   ;;  %v642_v4 = vld [vmem:[%s820_s0 + $0x10] sm:$0xff]  }
   0x2   :  { %v640_v1 = vld [vmem:[%s820_s0] sm:$0xff]   ;;  %634 = vmatprep.subr.msk.bf16.mxu1 %vm117_vm0, %v44_v0  ;;  %v119_v2 = vsel %vm117_vm0, %v44_v0, 0  ;;  %v643_v5 = vld [vmem:[%s820_s0 + $0x18] sm:$0xff]   ;;  %v649_v8 = vld [vmem:[%s823_s3 + $0x8] sm:$0xff]  }
   0x3   :  { %565 = vmatpush3.bf16.msra.mxu1 %v119_v2  ;;  %566 = vmatprep.mubr.msk.bf16.mxu1 %vm92_vm1, %v640_v1  ;;  %v644_v6 = vld [vmem:[%s820_s0 + $0x20] sm:$0xff]   ;;  %v650_v9 = vld [vmem:[%s823_s3 + $0x10] sm:$0xff]  }
   0x4   :  { %v648_v7 = vld [vmem:[%s823_s3] sm:$0xff]  }
   0x5   :  { %582 = vmatprep.subr.bf16.mxu1 %v648_v7 }
   0x6   :  { %567 = vmatmul.mubr.msk.bf16.vlgmr.msra.gmra.mrb[0].mxu1 %vm92_vm1, %v641_v3 }
   0x7   :  { %570 = vmatprep.mubr.msk.bf16.mxu1 %vm92_vm1, %v642_v4  ;;  %583 = vmatpush3.bf16.msra.mxu1 %v648_v7 }
   0x8   :  { %584 = vmatprep.subr.bf16.mxu1 %v649_v8 }
   0xb   :  { %585 = vmatpush3.bf16.msra.mxu1 %v649_v8 }
   0xe   :  { %571 = vmatmul.mubr.msk.bf16.gmra.mrb[4].mxu1 %vm92_vm1, %v643_v5 }
   0xf   :  { %574 = vmatprep.mubr.msk.bf16.mxu1 %vm92_vm1, %v644_v6 }
  0x10   :  { %12 = vsyncpa [#allocation3], 0  ;;  %v645_v10 = vld [vmem:[%s820_s0 + $0x28] sm:$0xff]   ;;  %586 = vmatprep.subr.bf16.mxu1 %v650_v9  ;;  %v651_v11 = vld [vmem:[%s823_s3 + $0x18] sm:$0xff]   ;;  %vm685_vm2 = vmmov 0   ;;  %s687_s13 = smov [#allocation2]  }
  0x11   :  { %v646_v12 = vld [vmem:[%s820_s0 + $0x30] sm:$0xff]   ;;  %587 = vmatpush3.bf16.msra.mxu1 %v650_v9  ;;  %v652_v13 = vld [vmem:[%s823_s3 + $0x20] sm:$0xff]   ;;  %v647_v14 = vld [vmem:[%s820_s0 + $0x38] sm:$0xff]   ;;  %s495_s14 = sshll.u32 %s687_s13, 4  ;;  %s496_s14 = int_to_ptr.vmem [resolvable:$true] %s495_s14 }
  0x12   :  { %588 = vmatprep.subr.bf16.mxu1 %v651_v11  ;;  %v653_v15 = vld [vmem:[%s823_s3 + $0x28] sm:$0xff]   ;;  %v654_v16 = vld [vmem:[%s823_s3 + $0x30] sm:$0xff]   ;;  %v655_v17 = vld [vmem:[%s823_s3 + $0x38] sm:$0xff]   ;;  %s660_s15 = scalar_lea.vmem %s496_s14, 16  ;;  %p665_p1 = scmp.lt.s32.totalorder %s496_s14, %s496_s14 }
  0x13   :  { %v503_v18 = vld [vmem:[%s822_s2] ss:$0 sm:$0xff]  ;;  %p661_p0 = scmp.ne.s32.totalorder %s496_s14, %s660_s15 }
  0x15   :  { %589 = vmatpush3.bf16.msra.mxu1 %v651_v11  ;;  %v684_v11 = vmov 0.0  }
  0x16   :  { %575 = vmatmul.mubr.msk.bf16.gmra.mrb[8].mxu1 %vm92_vm1, %v645_v10  ;;  %590 = vmatprep.subr.bf16.mxu1 %v652_v13 }
  0x17   :  { %578 = vmatprep.mubr.msk.bf16.mxu1 %vm92_vm1, %v646_v12  ;;  %614 = vmatprep.subr.bf16.mxu0 %v684_v11  ;;  %v475_v12 = vld [vmem:[%s826_s6] sm:$0x1] }
  0x18   :  { %630 = vmatprep.mubr.msk.bf16.mxu0 %vm685_vm2, %v684_v11 }
  0x19   :  { %591 = vmatpush3.bf16.msra.mxu1 %v652_v13  ;;  %v686_v13 = vmov 0  }
  0x1a   :  { %592 = vmatprep.subr.bf16.mxu1 %v653_v15  ;;  %639 = vset.pattern.permute.xlu0 %v686_v13 }
  0x1b   :  { %478 = vperm.xlu0 %639, %v475_v12  }
  0x1d   :  { %593 = vmatpush3.bf16.msra.mxu1 %v653_v15 }
  0x1e   :  { %579 = vmatmul.mubr.msk.bf16.gmra.mrb[12].mxu1 %vm92_vm1, %v647_v14  ;;  %594 = vmatprep.subr.bf16.mxu1 %v654_v16  ;;  %v520_v14 = vld [vmem:[%s824_s4] ss:$0 sm:$0xff] }
  0x21   :  { %595 = vmatpush3.bf16.msra.mxu1 %v654_v16 }
  0x22   :  { %596 = vmatprep.subr.bf16.mxu1 %v655_v17 }
  0x25   :  { %597 = vmatpush3.bf16.msra.mxu1 %v655_v17 }
  0xd9   :  { %v568_v19 = vpop.f32.mrb[0].mxu1 }
  0xda   :  { %v164_v20 = vadd.f32 %v568_v19, %v503_v18  ;;  %v155_v21 = vpop.f32.mrb[1].mxu1 }
  0xdb   :  { %v156_v22 = vadd.f32 %v503_v18, %v155_v21  ;;  %v569_v23 = vpop.f32.mrb[2].mxu1 }
  0xdc   :  { %v167_v24 = vadd.f32 %v569_v23, %v503_v18  ;;  %v158_v25 = vpop.f32.mrb[3].mxu1  ;;  %v220_v27 = vmax.f32 %v164_v20, 0.0 }
  0xdd   :  { %v159_v26 = vadd.f32 %v503_v18, %v158_v25  ;;  %v218_v29 = vmax.f32 %v156_v22, 0.0 }
  0xde   :  { %v221_v28 = vmax.f32 %v167_v24, 0.0 }
  0xdf   :  { %v219_v30 = vmax.f32 %v159_v26, 0.0 }
  0xe0   :  { %v235_v31 = vpack.c.bf16 %v221_v28, %v220_v27 }
  0xe1   :  { %v234_v32 = vpack.c.bf16 %v219_v30, %v218_v29  ;;  %v572_v33 = vpop.f32.mrb[4].mxu1 }
  0xe2   :  { %v180_v34 = vadd.f32 %v572_v33, %v503_v18  ;;  %v171_v35 = vpop.f32.mrb[5].mxu1 }
  0xe3   :  { %v172_v36 = vadd.f32 %v503_v18, %v171_v35  ;;  %598 = vmatprep.mubr.bf16.mxu1 %v234_v32  ;;  %v573_v37 = vpop.f32.mrb[6].mxu1 }
  0xe4   :  { %v224_v38 = vmax.f32 %v180_v34, 0.0  ;;  %v183_v39 = vadd.f32 %v573_v37, %v503_v18  ;;  %599 = vmatmul.mubr.bf16.vlgmr.msra.gmra.mrb[16].mxu1 %v235_v31  ;;  %v174_v40 = vpop.f32.mrb[7].mxu1 }
  0xe5   :  { %v222_v41 = vmax.f32 %v172_v36, 0.0  ;;  %v175_v42 = vadd.f32 %v503_v18, %v174_v40 }
  0xe6   :  { %v225_v43 = vmax.f32 %v183_v39, 0.0 }
  0xe7   :  { %v223_v44 = vmax.f32 %v175_v42, 0.0 }
  0xe8   :  { %v237_v45 = vpack.c.bf16 %v225_v43, %v224_v38 }
  0xe9   :  { %v236_v46 = vpack.c.bf16 %v223_v44, %v222_v41  ;;  %v576_v47 = vpop.f32.mrb[8].mxu1 }
  0xea   :  { %v196_v48 = vadd.f32 %v576_v47, %v503_v18  ;;  %v187_v49 = vpop.f32.mrb[9].mxu1 }
  0xeb   :  { %602 = vmatprep.mubr.bf16.mxu1 %v236_v46  ;;  %v188_v50 = vadd.f32 %v503_v18, %v187_v49  ;;  %v577_v51 = vpop.f32.mrb[10].mxu1 }
  0xec   :  { %603 = vmatmul.mubr.bf16.gmra.mrb[20].mxu1 %v237_v45  ;;  %v228_v52 = vmax.f32 %v196_v48, 0.0  ;;  %v199_v53 = vadd.f32 %v577_v51, %v503_v18  ;;  %v190_v54 = vpop.f32.mrb[11].mxu1 }
  0xed   :  { %v226_v55 = vmax.f32 %v188_v50, 0.0  ;;  %v191_v56 = vadd.f32 %v503_v18, %v190_v54 }
  0xee   :  { %v229_v57 = vmax.f32 %v199_v53, 0.0 }
  0xef   :  { %v227_v58 = vmax.f32 %v191_v56, 0.0 }
  0xf0   :  { %v239_v59 = vpack.c.bf16 %v229_v57, %v228_v52 }
  0xf1   :  { %v238_v60 = vpack.c.bf16 %v227_v58, %v226_v55  ;;  %v580_v61 = vpop.f32.mrb[12].mxu1 }
  0xf2   :  { %v212_v62 = vadd.f32 %v580_v61, %v503_v18  ;;  %v203_v63 = vpop.f32.mrb[13].mxu1 }
  0xf3   :  { %606 = vmatprep.mubr.bf16.mxu1 %v238_v60  ;;  %v204_v0 = vadd.f32 %v503_v18, %v203_v63  ;;  %v581_v1 = vpop.f32.mrb[14].mxu1 }
  0xf4   :  { %607 = vmatmul.mubr.bf16.gmra.mrb[24].mxu1 %v239_v59  ;;  %v232_v2 = vmax.f32 %v212_v62, 0.0  ;;  %v215_v3 = vadd.f32 %v581_v1, %v503_v18  ;;  %v206_v4 = vpop.f32.mrb[15].mxu1 }
  0xf5   :  { %v230_v5 = vmax.f32 %v204_v0, 0.0  ;;  %v207_v6 = vadd.f32 %v503_v18, %v206_v4 }
  0xf6   :  { %v233_v7 = vmax.f32 %v215_v3, 0.0 }
  0xf7   :  { %v231_v8 = vmax.f32 %v207_v6, 0.0 }
  0xf8   :  { %v241_v9 = vpack.c.bf16 %v233_v7, %v232_v2  ;;  %v426_v7 = vld [vmem:[%s825_s5] sm:$0xf]  ;;  %s664_s5 = scalar_lea.vmem %s496_s14, 32 }
  0xf9   :  { %v240_v10 = vpack.c.bf16 %v231_v8, %v230_v5  ;;  %v479_v8 = vpop.permute.xlu0 %478  ;;  %p666_p2 = scmp.lt.s32.totalorder %s664_s5, %s660_s15 }
  0xfb   :  { %610 = vmatprep.mubr.bf16.mxu1 %v240_v10  ;;  %p667_p3 = por %p666_p2, %p665_p1 }
  0xfc   :  { %611 = vmatmul.mubr.bf16.gmra.mrb[28].mxu1 %v241_v9 }
  0xfd   :  { %p668_p4 = pnand %p667_p3, %p661_p0 }
 0x1b7   :  { %v600_v15 = vpop.f32.mrb[16].mxu1 }
 0x1b8   :  { %v356_v16 = vadd.f32 %v600_v15, %v520_v14  ;;  %v347_v17 = vpop.f32.mrb[17].mxu1 }
 0x1b9   :  { %v348_v18 = vadd.f32 %v520_v14, %v347_v17  ;;  %v601_v19 = vpop.f32.mrb[18].mxu1 }
 0x1ba   :  { %v359_v20 = vadd.f32 %v601_v19, %v520_v14  ;;  %v350_v21 = vpop.f32.mrb[19].mxu1  ;;  %v412_v23 = vmax.f32 %v356_v16, 0.0 }
 0x1bb   :  { %v351_v22 = vadd.f32 %v520_v14, %v350_v21  ;;  %v410_v25 = vmax.f32 %v348_v18, 0.0 }
 0x1bc   :  { %v413_v24 = vmax.f32 %v359_v20, 0.0 }
 0x1bd   :  { %v411_v26 = vmax.f32 %v351_v22, 0.0 }
 0x1be   :  { %v428_v27 = vpack.c.bf16 %v413_v24, %v412_v23 }
 0x1bf   :  { %v604_v28 = vpop.f32.mrb[20].mxu1  ;;  %v427_v29 = vpack.c.bf16 %v411_v26, %v410_v25 }
 0x1c0   :  { %v372_v30 = vadd.f32 %v604_v28, %v520_v14  ;;  %v363_v31 = vpop.f32.mrb[21].mxu1 }
 0x1c1   :  { %v364_v32 = vadd.f32 %v520_v14, %v363_v31  ;;  %615 = vmatpush3.bf16.xpose.msra.mxu0 %v427_v29  ;;  %v605_v33 = vpop.f32.mrb[22].mxu1 }
 0x1c2   :  { %v416_v34 = vmax.f32 %v372_v30, 0.0  ;;  %v375_v35 = vadd.f32 %v605_v33, %v520_v14  ;;  %v366_v36 = vpop.f32.mrb[23].mxu1  ;;  %616 = vmatprep.subr.bf16.mxu0 %v684_v11 }
 0x1c3   :  { %v414_v37 = vmax.f32 %v364_v32, 0.0  ;;  %v367_v38 = vadd.f32 %v520_v14, %v366_v36 }
 0x1c4   :  { %v417_v39 = vmax.f32 %v375_v35, 0.0 }
 0x1c5   :  { %v415_v40 = vmax.f32 %v367_v38, 0.0 }
 0x1c6   :  { %v430_v41 = vpack.c.bf16 %v417_v39, %v416_v34 }
 0x1c7   :  { %v429_v42 = vpack.c.bf16 %v415_v40, %v414_v37  ;;  %v608_v43 = vpop.f32.mrb[24].mxu1 }
 0x1c8   :  { %v388_v44 = vadd.f32 %v608_v43, %v520_v14  ;;  %v379_v45 = vpop.f32.mrb[25].mxu1 }
 0x1c9   :  { %617 = vmatpush3.bf16.xpose.msra.mxu0 %v428_v27  ;;  %v380_v46 = vadd.f32 %v520_v14, %v379_v45  ;;  %v609_v47 = vpop.f32.mrb[26].mxu1 }
 0x1ca   :  { %v420_v48 = vmax.f32 %v388_v44, 0.0  ;;  %618 = vmatprep.subr.bf16.mxu0 %v684_v11  ;;  %v391_v49 = vadd.f32 %v609_v47, %v520_v14  ;;  %v382_v50 = vpop.f32.mrb[27].mxu1 }
 0x1cb   :  { %v418_v51 = vmax.f32 %v380_v46, 0.0  ;;  %v383_v52 = vadd.f32 %v520_v14, %v382_v50 }
 0x1cc   :  { %v421_v53 = vmax.f32 %v391_v49, 0.0 }
 0x1cd   :  { %v419_v54 = vmax.f32 %v383_v52, 0.0 }
 0x1ce   :  { %v432_v55 = vpack.c.bf16 %v421_v53, %v420_v48 }
 0x1cf   :  { %v431_v56 = vpack.c.bf16 %v419_v54, %v418_v51  ;;  %v612_v57 = vpop.f32.mrb[28].mxu1 }
 0x1d0   :  { %v404_v58 = vadd.f32 %v612_v57, %v520_v14  ;;  %v395_v59 = vpop.f32.mrb[29].mxu1 }
 0x1d1   :  { %619 = vmatpush3.bf16.xpose.msra.mxu0 %v429_v42  ;;  %v396_v60 = vadd.f32 %v520_v14, %v395_v59  ;;  %v613_v61 = vpop.f32.mrb[30].mxu1 }
 0x1d2   :  { %620 = vmatprep.subr.bf16.mxu0 %v684_v11  ;;  %v424_v62 = vmax.f32 %v404_v58, 0.0  ;;  %v407_v63 = vadd.f32 %v613_v61, %v520_v14  ;;  %v398_v0 = vpop.f32.mrb[31].mxu1 }
 0x1d3   :  { %v422_v1 = vmax.f32 %v396_v60, 0.0  ;;  %v399_v2 = vadd.f32 %v520_v14, %v398_v0 }
 0x1d4   :  { %v425_v3 = vmax.f32 %v407_v63, 0.0 }
 0x1d5   :  { %v423_v4 = vmax.f32 %v399_v2, 0.0 }
 0x1d6   :  { %v434_v5 = vpack.c.bf16 %v425_v3, %v424_v62 }
 0x1d7   :  { %v433_v6 = vpack.c.bf16 %v423_v4, %v422_v1 }
 0x1d9   :  { %621 = vmatpush3.bf16.xpose.msra.mxu0 %v430_v41 }
 0x1da   :  { %622 = vmatprep.subr.bf16.mxu0 %v684_v11 }
 0x1e1   :  { %623 = vmatpush3.bf16.xpose.msra.mxu0 %v431_v56 }
 0x1e2   :  { %624 = vmatprep.subr.bf16.mxu0 %v684_v11 }
 0x1e9   :  { %625 = vmatpush3.bf16.xpose.msra.mxu0 %v432_v55 }
 0x1ea   :  { %626 = vmatprep.subr.bf16.mxu0 %v684_v11 }
 0x1f1   :  { %627 = vmatpush3.bf16.xpose.msra.mxu0 %v433_v6 }
 0x1f2   :  { %628 = vmatprep.subr.bf16.mxu0 %v684_v11 }
 0x1f9   :  { %629 = vmatpush3.bf16.xpose.msra.mxu0 %v434_v5 }
 0x200   :  { %631 = vmatmul.mubr.bf16.vlgmr.msra.gmra.mrb[0].mxu0 %v426_v7 }
 0x2d3   :  { %v469_v9 = vpop.f32.mrb[0].mxu0 }
 0x2d4   :  { %v481_v10 = vadd.f32 %v479_v8, %v469_v9  ;;  %v632_v12 = vpop.f32.mrb[1].mxu0 }
 0x2d5   :  { %v472_v13 = vpop.f32.mrb[2].mxu0 }
 0x2d6   :  { %v529_v14 = vmul.f32 -1.442695, %v481_v10  ;;  %v633_v15 = vpop.f32.mrb[3].mxu0 }
 0x2d8   :  { %656 = vpow2.f32 %v529_v14 }
 0x2e2   :  { %v657_v16 = vpop.eup %656 }
 0x2e3   :  { %v485_v17 = vadd.f32 1.0, %v657_v16 }
 0x2e5   :  { %658 = vrcp.f32 %v485_v17 }
 0x2ef   :  { %v659_v11 = vpop.eup %658 }
 0x2f0   :  { %488 = vst [vmem:[#allocation2] sm:$0x1] %v659_v11 }
 0x2f1   :  { %671 = shalt.err (!%p668_p4)
}
 0x2f2   :  { %s672_s18 = scalar_lea.hbm %s827_s7, 16 }
 0x2f3   :  { %p673_p5 = scmp.ne.s32.totalorder %s827_s7, %s672_s18  ;;  %p676_p6 = scmp.lt.u32.totalorder %s672_s18, %s827_s7 }
 0x2f5   :  { %p678_p7 = pnand %p676_p6, %p673_p5 }
 0x2f7   :  { %681 = shalt.err (!%p678_p7)
}
 0x2f8   :  { %498 = dma.vmem_to_hbm [thread:$0]  %s496_s14, 16, %s827_s7, [#allocation3]  }
 0x2f9   :  { %682 = dma.done.wait [#allocation3], 16  }
 0x2fa   :  { %683 = vsyncadd [#allocation3], 4294967280 }
 0x2fb   :  { %502 = vsyncpa [#allocation3], 1 }

</bundles_post_ra>
